<compile_context>
chip_gen: v6e
topology: v6e:2x2x1
jax: 0.10.0
libtpu: 0.0.40
codegen_flags: <defaults>
</compile_context>

<pallas_src>
import functools

import jax
import jax.numpy as jnp
from jax import lax
from jax.experimental import pallas as pl
from jax.experimental.pallas import tpu as pltpu

LANES = 128
MAX_INKERNEL_SORT_B = 8       # above this, sort in the wrapper (O(B^2) network too big)
NCORES = 2                    # v7x TensorCores per chip; harmless (serial) on v5e/v6e
MIN_SPLIT_BLOCKS = 64         # don't bother splitting tiny inputs across cores
INPUT_BLOCK_BYTES = 4 << 20   # per-input per-buffer budget (x2 inputs x2 buffers = 16 MiB)
MAX_TILE_BLK = 8192
VMEM_LIMIT_BYTES = 32 << 20
BIG = 1e9                     # g-side pad constant: softplus(-(BIG - 0)) == 0 exactly in f32


def _round_up(v, m):
    return ((v + m - 1) // m) * m


def _was_loss_kernel(x_ref, g_ref, out_ref, *, B, chunk, n_full, rem):
    i = pl.program_id(1)

    @pl.when(i == 0)
    def _():
        out_ref[...] = jnp.zeros_like(out_ref)

    def chunk_loss(row_start, rows):
        # Load a lane-dense (rows, 128) slab per sort-axis index; upcast in-kernel.
        xs = [x_ref[b, pl.ds(row_start, rows), :].astype(jnp.float32) for b in range(B)]
        gs = [g_ref[b, pl.ds(row_start, rows), :].astype(jnp.float32) for b in range(B)]

        # Odd-even transposition sort along the (static, small) sort axis:
        # pure VPU min/max, unrolled at trace time.  No-op for B == 1.
        for p in range(B):
            for b in range(p % 2, B - 1, 2):
                xa, xb = xs[b], xs[b + 1]
                xs[b], xs[b + 1] = jnp.minimum(xa, xb), jnp.maximum(xa, xb)
                ga, gb = gs[b], gs[b + 1]
                gs[b], gs[b + 1] = jnp.minimum(ga, gb), jnp.maximum(ga, gb)

        # BCE-with-logits vs target 1: softplus(-z), numerically stable form.
        total = None
        for b in range(B):
            z = gs[b] - xs[b]
            l = jnp.maximum(-z, 0.0) + jnp.log1p(jnp.exp(-jnp.abs(z)))
            total = l if total is None else total + l

        # (rows,128) -> (rows//8, 8, 128) groups exactly along vreg tiles
        # (layout no-op); summing axis 0 collapses the slab to one (8,128) vreg.
        return jnp.sum(total.reshape(rows // 8, 8, LANES), axis=0)

    acc = jnp.zeros((8, LANES), jnp.float32)
    if n_full == 1:
        acc = acc + chunk_loss(0, chunk)
    else:
        def body(c, a):
            start = pl.multiple_of(c * chunk, chunk)
            return a + chunk_loss(start, chunk)
        acc = lax.fori_loop(0, n_full, body, acc)
    if rem:
        acc = acc + chunk_loss(n_full * chunk, rem)

    out_ref[0] += acc


def was_loss(true_data, fake_data):
    """Pallas implementation of WasLoss.forward."""
    assert true_data.shape == fake_data.shape
    B = int(true_data.shape[0])
    n = int(true_data.size)
    M = n // B

    x = true_data.reshape(B, M)
    g = fake_data.reshape(B, M)

    if B > MAX_INKERNEL_SORT_B:
        # TODO(synk): no clean Pallas TPU sort primitive for a large sort axis;
        # pre-sort with XLA.  After that the loss is purely elementwise, so
        # flatten to (1, n) and block bytes stop scaling with B.
        x = jnp.sort(x, axis=0).reshape(1, n)
        g = jnp.sort(g, axis=0).reshape(1, n)
        Bk, Mk = 1, n
    else:
        Bk, Mk = B, M

    itemsize = jnp.dtype(true_data.dtype).itemsize
    row_align = max(8, 32 // itemsize)          # 8 for f32, 16 for bf16, 32 for fp8
    n_blk_raw = pl.cdiv(Mk, LANES)

    ncores = NCORES if n_blk_raw >= MIN_SPLIT_BLOCKS else 1

    # VMEM-budgeted tile: block bytes = Bk * tile_blk * 128 * itemsize.
    tile_budget = INPUT_BLOCK_BYTES // (Bk * LANES * itemsize)
    tile_budget = max(row_align, min(MAX_TILE_BLK, (tile_budget // row_align) * row_align))

    per_core = pl.cdiv(n_blk_raw, ncores)
    tile_blk = min(tile_budget, _round_up(per_core, row_align))
    tiles_per_core = pl.cdiv(n_blk_raw, ncores * tile_blk)
    # Refit the tile so the padded grid hugs the real row count (<row_align waste/step).
    tile_blk = _round_up(pl.cdiv(n_blk_raw, ncores * tiles_per_core), row_align)
    n_blk = ncores * tiles_per_core * tile_blk

    # In-kernel row chunking bounds live vregs to ~2*Bk chunk slabs.
    chunk = max(row_align, min(512, (1024 // (2 * Bk)) // row_align * row_align))
    chunk = min(chunk, tile_blk)
    n_full = tile_blk // chunk
    rem = tile_blk % chunk

    pad_cols = n_blk * LANES - Mk
    if pad_cols:
        # Asymmetric constants: padded columns contribute exactly 0 to the loss
        # and are constant along the sort axis (so the in-kernel sort is unaffected).
        # TODO(synk): this is one extra HBM pass when M is ragged; handling the
        # ragged tail in-kernel would avoid it at the cost of per-step masking.
        x = jnp.pad(x, ((0, 0), (0, pad_cols)), constant_values=0.0)
        g = jnp.pad(g, ((0, 0), (0, pad_cols)), constant_values=BIG)

    x3 = x.reshape(Bk, n_blk, LANES)
    g3 = g.reshape(Bk, n_blk, LANES)

    tile_spec = pl.BlockSpec((Bk, tile_blk, LANES),
                             lambda c, i: (0, c * tiles_per_core + i, 0))
    out_spec = pl.BlockSpec((1, 8, LANES), lambda c, i: (c, 0, 0))

    elems = Bk * n_blk * LANES
    cost = pl.CostEstimate(
        flops=10 * elems,
        transcendentals=2 * elems,
        bytes_accessed=2 * elems * itemsize + ncores * 8 * LANES * 4,
    )

    partials = pl.pallas_call(
        functools.partial(_was_loss_kernel, B=Bk, chunk=chunk, n_full=n_full, rem=rem),
        out_shape=jax.ShapeDtypeStruct((ncores, 8, LANES), jnp.float32),
        grid_spec=pltpu.PrefetchScalarGridSpec(
            num_scalar_prefetch=0,
            grid=(ncores, tiles_per_core),
            in_specs=[tile_spec, tile_spec],
            out_specs=out_spec,
        ),
        compiler_params=pltpu.CompilerParams(
            dimension_semantics=("parallel", "arbitrary"),
            vmem_limit_bytes=VMEM_LIMIT_BYTES,
        ),
        cost_estimate=cost,
    )(x3, g3)

    # Mean over the *real* element count (padding contributes exactly 0).
    return jnp.sum(partials) * jnp.float32(1.0 / n)


if __name__ == "__main__":
    key = jax.random.PRNGKey(0)
    kx, kg = jax.random.split(key)

    # Discriminator logits for real (true_data) and generated (fake_data) samples.
    # NCHW-shaped patch-discriminator logits: (batch=2, channels=4, H=16, W=16).
    shape = (2, 4, 16, 16)
    true_data = jax.random.normal(kx, shape, dtype=jnp.float32)
    fake_data = jax.random.normal(kg, shape, dtype=jnp.float32)

    loss = was_loss(true_data, fake_data)
    loss = jax.block_until_ready(loss)

    # Pure-JAX reference matching the PyTorch module.
    slx = jnp.sort(true_data, axis=0)
    slg = jnp.sort(fake_data, axis=0)
    z = slg - slx
    ref = jnp.mean(jnp.maximum(-z, 0.0) + jnp.log1p(jnp.exp(-jnp.abs(z))))
    assert jnp.allclose(loss, ref, rtol=1e-5, atol=1e-5), (loss, ref)

    print("KERNEL_OK")
</pallas_src>

<mosaic_0001>
module attributes {stable_mosaic.version = 11 : i64} {
  func.func @_was_loss_kernel(%arg0: i32, %arg1: i32, %arg2: memref<2x8x128xf32, #tpu.memory_space<vmem>>, %arg3: memref<2x8x128xf32, #tpu.memory_space<vmem>>, %arg4: memref<1x8x128xf32, #tpu.memory_space<vmem>>) attributes {dimension_semantics = [#tpu.dimension_semantics<parallel>, #tpu.dimension_semantics<arbitrary>], iteration_bounds = array<i64: 1, 1>, scalar_prefetch = 0 : i64, scratch_operands = 0 : i64, tpu.core_type = #tpu.core_type<tc>, window_params = [{transform_indices = @transform_0, window_bounds = array<i64: 2, 8, 128>}, {transform_indices = @transform_1, window_bounds = array<i64: 2, 8, 128>}, {transform_indices = @transform_2, window_bounds = array<i64: 1, 8, 128>}]} {
    %c0_i32 = arith.constant 0 : i32
    %0 = arith.cmpi eq, %arg1, %c0_i32 : i32
    %1 = arith.extui %0 : i1 to i32
    %c0_i32_0 = arith.constant 0 : i32
    %2 = arith.cmpi ne, %1, %c0_i32_0 : i32
    scf.if %2 {
      %cst_24 = arith.constant 0.000000e+00 : f32
      %48 = vector.broadcast %cst_24 : f32 to vector<1x8x128xf32>
      %c0_25 = arith.constant 0 : index
      %c0_26 = arith.constant 0 : index
      %c0_27 = arith.constant 0 : index
      %49 = vector.load %arg4[%c0_25, %c0_26, %c0_27] : memref<1x8x128xf32, #tpu.memory_space<vmem>>, vector<1x8x128xf32>
      tpu.vector_store %arg4[%c0_25, %c0_26, %c0_27], %48 {strides = array<i32>} : memref<1x8x128xf32, #tpu.memory_space<vmem>>, vector<1x8x128xf32>,
    } else {
    }
    %cst = arith.constant 0.000000e+00 : f32
    %3 = vector.broadcast %cst : f32 to vector<8x128xf32>
    %c0 = arith.constant 0 : index
    %c0_1 = arith.constant 0 : index
    %c0_2 = arith.constant 0 : index
    %4 = vector.load %arg2[%c0, %c0_1, %c0_2] : memref<2x8x128xf32, #tpu.memory_space<vmem>>, vector<1x8x128xf32>
    %5 = vector.shape_cast %4 : vector<1x8x128xf32> to vector<8x128xf32>
    %c1 = arith.constant 1 : index
    %c0_3 = arith.constant 0 : index
    %c0_4 = arith.constant 0 : index
    %6 = vector.load %arg2[%c1, %c0_3, %c0_4] : memref<2x8x128xf32, #tpu.memory_space<vmem>>, vector<1x8x128xf32>
    %7 = vector.shape_cast %6 : vector<1x8x128xf32> to vector<8x128xf32>
    %c0_5 = arith.constant 0 : index
    %c0_6 = arith.constant 0 : index
    %c0_7 = arith.constant 0 : index
    %8 = vector.load %arg3[%c0_5, %c0_6, %c0_7] : memref<2x8x128xf32, #tpu.memory_space<vmem>>, vector<1x8x128xf32>
    %9 = vector.shape_cast %8 : vector<1x8x128xf32> to vector<8x128xf32>
    %c1_8 = arith.constant 1 : index
    %c0_9 = arith.constant 0 : index
    %c0_10 = arith.constant 0 : index
    %10 = vector.load %arg3[%c1_8, %c0_9, %c0_10] : memref<2x8x128xf32, #tpu.memory_space<vmem>>, vector<1x8x128xf32>
    %11 = vector.shape_cast %10 : vector<1x8x128xf32> to vector<8x128xf32>
    %12 = arith.minimumf %5, %7 : vector<8x128xf32>
    %13 = arith.maximumf %5, %7 : vector<8x128xf32>
    %14 = arith.minimumf %9, %11 : vector<8x128xf32>
    %15 = arith.maximumf %9, %11 : vector<8x128xf32>
    %16 = arith.subf %14, %12 : vector<8x128xf32>
    %cst_11 = arith.constant 0.000000e+00 : f32
    %17 = vector.broadcast %cst_11 : f32 to vector<8x128xf32>
    %18 = arith.subf %17, %16 : vector<8x128xf32>
    %cst_12 = arith.constant 0.000000e+00 : f32
    %19 = vector.broadcast %cst_12 : f32 to vector<8x128xf32>
    %20 = arith.maximumf %18, %19 : vector<8x128xf32>
    %21 = math.absf %16 : vector<8x128xf32>
    %cst_13 = arith.constant 0.000000e+00 : f32
    %22 = vector.broadcast %cst_13 : f32 to vector<8x128xf32>
    %23 = arith.subf %22, %21 : vector<8x128xf32>
    %24 = math.exp %23 : vector<8x128xf32>
    %25 = math.log1p %24 : vector<8x128xf32>
    %26 = arith.addf %20, %25 : vector<8x128xf32>
    %27 = arith.subf %15, %13 : vector<8x128xf32>
    %cst_14 = arith.constant 0.000000e+00 : f32
    %28 = vector.broadcast %cst_14 : f32 to vector<8x128xf32>
    %29 = arith.subf %28, %27 : vector<8x128xf32>
    %cst_15 = arith.constant 0.000000e+00 : f32
    %30 = vector.broadcast %cst_15 : f32 to vector<8x128xf32>
    %31 = arith.maximumf %29, %30 : vector<8x128xf32>
    %32 = math.absf %27 : vector<8x128xf32>
    %cst_16 = arith.constant 0.000000e+00 : f32
    %33 = vector.broadcast %cst_16 : f32 to vector<8x128xf32>
    %34 = arith.subf %33, %32 : vector<8x128xf32>
    %35 = math.exp %34 : vector<8x128xf32>
    %36 = math.log1p %35 : vector<8x128xf32>
    %37 = arith.addf %31, %36 : vector<8x128xf32>
    %38 = arith.addf %26, %37 : vector<8x128xf32>
    %39 = vector.shape_cast %38 : vector<8x128xf32> to vector<1x8x128xf32>
    %cst_17 = arith.constant dense<0.000000e+00> : vector<8x128xf32>
    %40 = vector.multi_reduction <add>, %39, %cst_17 [0] : vector<1x8x128xf32> to vector<8x128xf32>
    %41 = arith.addf %3, %40 : vector<8x128xf32>
    %c0_18 = arith.constant 0 : index
    %c0_19 = arith.constant 0 : index
    %c0_20 = arith.constant 0 : index
    %42 = vector.load %arg4[%c0_18, %c0_19, %c0_20] : memref<1x8x128xf32, #tpu.memory_space<vmem>>, vector<1x8x128xf32>
    %43 = vector.shape_cast %42 : vector<1x8x128xf32> to vector<8x128xf32>
    %44 = arith.addf %43, %41 : vector<8x128xf32>
    %c0_21 = arith.constant 0 : index
    %c0_22 = arith.constant 0 : index
    %c0_23 = arith.constant 0 : index
    %45 = vector.load %arg4[%c0_21, %c0_22, %c0_23] : memref<1x8x128xf32, #tpu.memory_space<vmem>>, vector<1x8x128xf32>
    %46 = vector.shape_cast %45 : vector<1x8x128xf32> to vector<8x128xf32>
    %47 = vector.shape_cast %44 : vector<8x128xf32> to vector<1x8x128xf32>
    tpu.vector_store %arg4[%c0_21, %c0_22, %c0_23], %47 {strides = array<i32>} : memref<1x8x128xf32, #tpu.memory_space<vmem>>, vector<1x8x128xf32>,
    return
  }
  func.func @transform_0(%arg0: i32, %arg1: i32) -> (i32, i32, i32) {
    %c1_i32 = arith.constant 1 : i32
    %0 = arith.muli %arg0, %c1_i32 : i32
    %1 = arith.addi %0, %arg1 : i32
    %c0_i32 = arith.constant 0 : i32
    %c0_i32_0 = arith.constant 0 : i32
    %c0_i32_1 = arith.constant 0 : i32
    return %c0_i32, %1, %c0_i32_0 : i32, i32, i32
  }
  func.func @transform_1(%arg0: i32, %arg1: i32) -> (i32, i32, i32) {
    %c1_i32 = arith.constant 1 : i32
    %0 = arith.muli %arg0, %c1_i32 : i32
    %1 = arith.addi %0, %arg1 : i32
    %c0_i32 = arith.constant 0 : i32
    %c0_i32_0 = arith.constant 0 : i32
    %c0_i32_1 = arith.constant 0 : i32
    return %c0_i32, %1, %c0_i32_0 : i32, i32, i32
  }
  func.func @transform_2(%arg0: i32, %arg1: i32) -> (i32, i32, i32) {
    %c0_i32 = arith.constant 0 : i32
    %c0_i32_0 = arith.constant 0 : i32
    %c0_i32_1 = arith.constant 0 : i32
    return %arg0, %c0_i32, %c0_i32_0 : i32, i32, i32
  }
}

</mosaic_0001>

<bundles_post_ra>
// kernel: tpu_custom_call.1
= control target key start
LH: loop header
LB: loop body
LE: loop exit
PB: predicated region body
PF: predicated region fallthrough
CT: control target
= control target key end

     0   :  { %7 = vsyncpa [#allocation3], 0  ;;  %s228_s0 = inlined_call_operand.hbm [shape: f32[2,8,128], index: 0, kind: input, shape index: {}]   ;;  %s229_s1 = inlined_call_operand.hbm [shape: f32[2,8,128], index: 1, kind: input, shape index: {}]   ;;  %s230_s2 = inlined_call_operand.hbm [shape: f32[1,8,128], index: 2, kind: output, shape index: {}]  }
   0x1   :  { %8 = vsyncpa [#allocation6], 0 }
   0x2   :  { %9 = vsyncpa [#allocation4], 0  ;;  %s199_s9 = smov [#allocation2]  }
   0x3   :  { %s18_s10 = sshll.u32 %s199_s9, 4  ;;  %s19_s10 = int_to_ptr.vmem [resolvable:$true] %s18_s10 }
   0x4   :  { %s141_s11 = scalar_lea.vmem %s19_s10, 256  ;;  %p146_p1 = scmp.lt.s32.totalorder %s19_s10, %s19_s10 }
   0x5   :  { %p142_p0 = scmp.ne.s32.totalorder %s19_s10, %s141_s11  ;;  %p147_p2 = scmp.lt.s32.totalorder %s141_s11, %s141_s11 }
   0x7   :  { %p148_p3 = por %p147_p2, %p146_p1 }
   0x9   :  { %p149_p4 = pnand %p148_p3, %p142_p0 }
   0xb   :  { %152 = shalt.err (!%p149_p4)
}
   0xc   :  { %s200_s12 = smov 128   ;;  %s201_s13 = smov 8  }
   0xd   :  { %24 = dma.hbm_to_vmem [thread:$0]  %s228_s0, 256, %s19_s10, [#allocation3], %s200_s12, %s200_s12, %s201_s13  }
   0xe   :  { %s202_s16 = smov [#allocation5]  }
   0xf   :  { %s33_s17 = sshll.u32 %s202_s16, 4  ;;  %s34_s17 = int_to_ptr.vmem [resolvable:$true] %s33_s17 }
  0x10   :  { %s161_s18 = scalar_lea.vmem %s34_s17, 256  ;;  %p166_p6 = scmp.lt.s32.totalorder %s34_s17, %s34_s17 }
  0x11   :  { %p162_p5 = scmp.ne.s32.totalorder %s34_s17, %s161_s18  ;;  %p167_p7 = scmp.lt.s32.totalorder %s161_s18, %s161_s18 }
  0x13   :  { %p168_p8 = por %p167_p7, %p166_p6 }
  0x15   :  { %p169_p9 = pnand %p168_p8, %p162_p5 }
  0x17   :  { %172 = shalt.err (!%p169_p9)
}
  0x18   :  { %39 = dma.hbm_to_vmem [thread:$0]  %s229_s1, 256, %s34_s17, [#allocation6], %s200_s12, %s200_s12, %s201_s13  }
  0x19   :  { %193 = dma.done.wait [#allocation3], 256  }
  0x1a   :  { %194 = vsyncadd [#allocation3], 4294967040 }
  0x1b   :  { %195 = dma.done.wait [#allocation6], 256  }
  0x1c   :  { %196 = vsyncadd [#allocation6], 4294967040  ;;  %v53_v0 = vld [vmem:[#allocation2] sm:$0xff]  ;;  %v55_v1 = vld [vmem:[#allocation2 + $0x8] sm:$0xff]  ;;  %s203_s0 = smov [#allocation7]  }
  0x1d   :  { %v56_v2 = vld [vmem:[#allocation5] sm:$0xff]  ;;  %v58_v3 = vld [vmem:[#allocation5 + $0x8] sm:$0xff]  ;;  %v59_v4 = vmin.f32 %v53_v0, %v55_v1  ;;  %v60_v5 = vmax.f32 %v53_v0, %v55_v1  ;;  %s109_s1 = sshll.u32 %s203_s0, 4  ;;  %s110_s1 = int_to_ptr.vmem [resolvable:$true] %s109_s1 }
  0x1e   :  { %v61_v6 = vmin.f32 %v56_v2, %v58_v3  ;;  %v62_v7 = vmax.f32 %v56_v2, %v58_v3  ;;  %s173_s21 = scalar_lea.vmem %s110_s1, 128  ;;  %p178_p11 = scmp.lt.s32.totalorder %s110_s1, %s110_s1 }
  0x1f   :  { %p174_p10 = scmp.ne.s32.totalorder %s110_s1, %s173_s21  ;;  %p179_p12 = scmp.lt.s32.totalorder %s173_s21, %s173_s21 }
  0x20   :  { %v63_v8 = vsub.f32 %v61_v6, %v59_v4  ;;  %v80_v9 = vsub.f32 %v62_v7, %v60_v5 }
  0x21   :  { %p180_p13 = por %p179_p12, %p178_p11 }
  0x22   :  { %v66_v10 = vand.u32 2147483647, %v63_v8  ;;  %v83_v11 = vand.u32 2147483647, %v80_v9  ;;  %v64_v23 = vsub.f32 0.0, %v63_v8  ;;  %v81_v26 = vsub.f32 0.0, %v80_v9 }
  0x23   :  { %p181_p0 = pnand %p180_p13, %p174_p10 }
  0x24   :  { %v67_v12 = vsub.f32 0.0, %v66_v10  ;;  %v84_v13 = vsub.f32 0.0, %v83_v11  ;;  %v65_v30 = vmax.f32 %v64_v23, 0.0  ;;  %v82_v34 = vmax.f32 %v81_v26, 0.0 }
  0x26   :  { %v68_v14 = vmul.f32 1.442695, %v67_v12  ;;  %v85_v15 = vmul.f32 1.442695, %v84_v13 }
  0x28   :  { %125 = vpow2.f32 %v68_v14 }
  0x29   :  { %127 = vpow2.f32 %v85_v15 }
  0x35   :  { %v126_v16 = vpop.eup %125 }
  0x36   :  { %v128_v17 = vpop.eup %127  ;;  %v70_v18 = vadd.f32 1.0, %v126_v16  ;;  %v73_v20 = vmul.f32 -0.5, %v126_v16  ;;  %v76_v24 = vand.u32 2147483647, %v126_v16 }
  0x37   :  { %v87_v19 = vadd.f32 1.0, %v128_v17  ;;  %v90_v21 = vmul.f32 -0.5, %v128_v17  ;;  %v93_v27 = vand.u32 2147483647, %v128_v17 }
  0x38   :  { %129 = vlog2.f32 %v70_v18  ;;  %v74_v22 = vadd.f32 1.0, %v73_v20  ;;  %vm77_vm0 = vcmp.lt.f32.partialorder %v76_v24, 0.0004427343 }
  0x39   :  { %131 = vlog2.f32 %v87_v19  ;;  %v91_v25 = vadd.f32 1.0, %v90_v21  ;;  %vm94_vm1 = vcmp.lt.f32.partialorder %v93_v27, 0.0004427343 }
  0x3a   :  { %v75_v28 = vmul.f32 %v126_v16, %v74_v22 }
  0x3b   :  { %v92_v31 = vmul.f32 %v128_v17, %v91_v25 }
  0x45   :  { %v130_v29 = vpop.eup %129 }
  0x46   :  { %v132_v32 = vpop.eup %131  ;;  %v72_v33 = vmul.f32 0.6931472, %v130_v29 }
  0x47   :  { %v89_v35 = vmul.f32 0.6931472, %v132_v32 }
  0x48   :  { %v78_v36 = vsel %vm77_vm0, %v75_v28, %v72_v33 }
  0x49   :  { %v79_v37 = vadd.f32 %v78_v36, %v65_v30  ;;  %v95_v38 = vsel %vm94_vm1, %v92_v31, %v89_v35 }
  0x4a   :  { %v96_v39 = vadd.f32 %v95_v38, %v82_v34 }
  0x4c   :  { %v97_v40 = vadd.f32 %v96_v39, %v79_v37 }
  0x4e   :  { %102 = vst [vmem:[#allocation7] sm:$0xff] %v97_v40 }
  0x4f   :  { %184 = shalt.err (!%p181_p0)
}
  0x50   :  { %112 = dma.vmem_to_hbm [thread:$0]  %s110_s1, 128, %s230_s2, [#allocation4]  }
  0x51   :  { %197 = dma.done.wait [#allocation4], 128  }
  0x52   :  { %198 = vsyncadd [#allocation4], 4294967168 }
  0x53   :  { %116 = vsyncpa [#allocation3], 1 }
  0x54   :  { %117 = vsyncpa [#allocation6], 1 }
  0x55   :  { %118 = vsyncpa [#allocation4], 1 }

</bundles_post_ra>
